<compile_context>
chip_gen: v7x
topology: tpu7x:2x2x1
jax: 0.10.0
libtpu: 0.0.40
codegen_flags: <defaults>
</compile_context>

<pallas_src>
import functools

import jax
import jax.numpy as jnp
from jax import lax
from jax.experimental import pallas as pl
from jax.experimental.pallas import tpu as pltpu

NEG_SLOPE = -0.1  # nn.LeakyReLU(-0.1)


def _small_lhs_matmul(a_rr, b_rn):
    """(R, R) @ (R, N) with tiny R done on the VPU as R broadcast-FMAs (skips MXU)."""
    r = a_rr.shape[1]
    out = a_rr[:, 0:1] * b_rn[0:1, :]
    for k in range(1, r):
        out = out + a_rr[:, k:k + 1] * b_rn[k:k + 1, :]
    return out


def _single_layer_kernel(bm_ref, v_ref, wt_ref, w_ref, h_ref,
                         h_out_ref, w_out_ref,
                         gram_sc, hht_sc, gnw_sc,
                         *, true_nb_c, needs_mask):
    c = pl.program_id(1)
    last_c = pl.num_programs(1) - 1

    # --- per-batch-element init (first column tile) ---
    @pl.when(c == 0)
    def _():
        # Gram = W^T W (R, R): lane-dense W^T streamed, tiny (nb_l, R) stationary.
        gram_sc[...] = jnp.dot(wt_ref[0], w_ref[0],
                               preferred_element_type=jnp.float32)
        hht_sc[...] = jnp.zeros_like(hht_sc)
        gnw_sc[...] = jnp.zeros_like(gnw_sc)

    V = v_ref[0]                                   # (nb_l, tc)  native dtype
    Hf = h_ref[0].astype(jnp.float32)              # (R, tc)     f32 for elementwise math

    # --- H update (column-local) ---
    # Gn = W^T V  (R, tc): contraction over nb_l.
    # TODO(synk): this is the one remaining place where V sits on the MXU stationary
    # path; a VPU broadcast-FMA over nb_l (review option) could overlap it with the
    # streamed Gn_w/HHt pass — kept on MXU here for robustness.
    Gn = jnp.dot(wt_ref[0], V, preferred_element_type=jnp.float32)
    # Gp = (W^T W) H  (R, tc): tiny-K contraction done on the VPU.
    Gp = _small_lhs_matmul(gram_sc[...], Hf)
    # Divide -> EUP approximate reciprocal + VPU multiply (frees VALU slots).
    Hn = Hf * Gn * pl.reciprocal(Gp, approx=True)

    if needs_mask:
        tc = Hn.shape[-1]
        col = c * tc + lax.broadcasted_iota(jnp.int32, (1, tc), 1)
        Hn = jnp.where(col < true_nb_c, Hn, 0.0)   # keep padded cols out of the accumulators

    h_out_ref[0] = Hn.astype(h_out_ref.dtype)

    # --- accumulate the W-update reductions (over the nb_c tiles) ---
    # Both contractions share the identical stationary operand Hn^T (tc, R), issued
    # back-to-back so the pushed MXU weights can be reused; the big V tile is the
    # streamed LHS, never the stationary/weight operand.
    Hn_acc = Hn.astype(v_ref.dtype)
    hht_sc[...] += lax.dot_general(Hn_acc, Hn_acc, (((1,), (1,)), ((), ())),
                                   preferred_element_type=jnp.float32)
    gnw_sc[...] += lax.dot_general(V, Hn_acc, (((1,), (1,)), ((), ())),
                                   preferred_element_type=jnp.float32)

    # --- W update: once per batch element, after the last column tile ---
    @pl.when(c == last_c)
    def _():
        Wf = w_ref[0].astype(jnp.float32)          # (nb_l, R)
        Bm = bm_ref[0].astype(jnp.float32)         # (nb_l, R) = LeakyReLU(Aw), hoisted
        # Gp_w = W (Hn Hn^T): streams nb_l rows through the tiny (R, R) weight.
        Gp_w = jnp.dot(Wf, hht_sc[...], preferred_element_type=jnp.float32)
        Wn = Wf * (Bm * (gnw_sc[...] / Gp_w))      # cold path: exact divide
        w_out_ref[0] = Wn.astype(w_out_ref.dtype)


def _vmem_capacity_bytes():
    try:
        return int(pltpu.get_tpu_info().vmem_capacity_bytes)
    except Exception:
        return 64 * 1024 * 1024  # conservative default (v7x per-core VMEM)


def _ceil_to(x, m):
    return -(-x // m) * m


def single_layer_forward(Aw, V, W, H):
    """Aw: (1, nb_l, R), V: (B, nb_l, nb_c), W: (B, nb_l, R), H: (B, R, nb_c)."""
    b, m, n = V.shape
    r = W.shape[2]
    assert Aw.shape == (1, m, r)
    assert W.shape == (b, m, r)
    assert H.shape == (b, r, n)

    # Hoisted, batch-invariant LeakyReLU(-0.1)(Aw).
    Bm = jnp.where(Aw >= 0, Aw, NEG_SLOPE * Aw).astype(jnp.float32)
    # Lane-dense W^T for Gn / Gram (layout plumbing kept outside the kernel).
    Wt = jnp.swapaxes(W, 1, 2)                     # (B, R, nb_l)

    # ---- generation-aware column tiling: the double-buffered V tile dominates
    # ---- VMEM; keep it under ~1/4 of this chip's VMEM (v5e/v6e: 128 MiB, v7x: 64 MiB).
    itemsize = jnp.dtype(V.dtype).itemsize
    vmem_cap = _vmem_capacity_bytes()
    budget = vmem_cap // 4
    max_cols = max(128, budget // max(2 * m * itemsize, 1))
    tile_c = min(2048, (max_cols // 128) * 128)
    tile_c = max(128, min(tile_c, _ceil_to(n, 128)))
    n_pad = _ceil_to(n, tile_c)
    n_tiles = n_pad // tile_c
    needs_mask = (n_pad != n)

    if needs_mask:
        # TODO(synk): padding copies V/H once in HBM; a partial-last-tile path
        # (pl.BoundedSlice) would avoid that copy when nb_c is not a multiple of 128.
        V_p = jnp.pad(V, ((0, 0), (0, 0), (0, n_pad - n)))
        H_p = jnp.pad(H, ((0, 0), (0, 0), (0, n_pad - n)))
    else:
        V_p, H_p = V, H

    # VMEM limit: estimated footprint + headroom, never above (chip VMEM - 16 MiB).
    est = (2 * m * tile_c * itemsize              # double-buffered V tile
           + 4 * r * tile_c * 4                   # H in/out tiles
           + 10 * m * 128 * 4                     # lane-padded (nb_l, R) blocks + scratch
           + (8 << 20))                           # compiler scratch headroom
    vmem_limit = int(min(max(est, 32 << 20), max(vmem_cap - (16 << 20), 32 << 20)))

    kernel = functools.partial(_single_layer_kernel,
                               true_nb_c=n, needs_mask=needs_mask)

    h_new, w_new = pl.pallas_call(
        kernel,
        out_shape=(
            jax.ShapeDtypeStruct((b, r, n_pad), H.dtype),   # H_new (padded cols)
            jax.ShapeDtypeStruct((b, m, r), W.dtype),       # W_new (natural layout)
        ),
        grid_spec=pltpu.PrefetchScalarGridSpec(
            num_scalar_prefetch=0,
            grid=(b, n_tiles),
            in_specs=[
                pl.BlockSpec((1, m, r), lambda i, j: (0, 0, 0)),        # Bm (shared)
                pl.BlockSpec((1, m, tile_c), lambda i, j: (i, 0, j)),   # V tile
                pl.BlockSpec((1, r, m), lambda i, j: (i, 0, 0)),        # W^T (resident)
                pl.BlockSpec((1, m, r), lambda i, j: (i, 0, 0)),        # W   (resident)
                pl.BlockSpec((1, r, tile_c), lambda i, j: (i, 0, j)),   # H tile
            ],
            out_specs=(
                pl.BlockSpec((1, r, tile_c), lambda i, j: (i, 0, j)),   # H_new tile
                pl.BlockSpec((1, m, r), lambda i, j: (i, 0, 0)),        # W_new (resident)
            ),
            scratch_shapes=[
                pltpu.VMEM((r, r), jnp.float32),   # Gram = W^T W
                pltpu.VMEM((r, r), jnp.float32),   # Hn Hn^T accumulator
                pltpu.VMEM((m, r), jnp.float32),   # Gn_w = V Hn^T accumulator
            ],
        ),
        compiler_params=pltpu.CompilerParams(
            dimension_semantics=("parallel", "arbitrary"),
            vmem_limit_bytes=vmem_limit,
        ),
    )(Bm, V_p, Wt, W, H_p)

    if needs_mask:
        h_new = h_new[:, :, :n]
    return h_new, w_new


def _reference(Aw, V, W, H):
    """Pure-JAX reference mirroring the PyTorch forward."""
    Wt = jnp.swapaxes(W, 1, 2)
    Gp = jnp.matmul(Wt, jnp.matmul(W, H))
    Gn = jnp.matmul(Wt, V)
    B = jnp.where(Aw >= 0, Aw, NEG_SLOPE * Aw)
    Hn = H * (Gn / Gp)
    Hnt = jnp.swapaxes(Hn, 1, 2)
    Gp_w = jnp.matmul(W, jnp.matmul(Hn, Hnt))
    Gn_w = jnp.matmul(V, Hnt)
    Wn = W * (B * (Gn_w / Gp_w))
    return Hn, Wn


if __name__ == "__main__":
    batch, nb_l, nb_c, R = 2, 16, 16, 4

    key = jax.random.PRNGKey(0)
    kv, kw, kh = jax.random.split(key, 3)

    # Strictly positive inputs (NMF multiplicative updates assume nonnegativity;
    # also avoids division-by-zero in Gn/Gp — the PyTorch reference has the same hazard).
    V = jax.random.uniform(kv, (batch, nb_l, nb_c), jnp.float32, 0.1, 1.0)
    W = jax.random.uniform(kw, (batch, nb_l, R), jnp.float32, 0.1, 1.0)
    H = jax.random.uniform(kh, (batch, R, nb_c), jnp.float32, 0.1, 1.0)

    # Parameter Aw initialized exactly as in __init__: ones of shape (1, nb_l, 4).
    Aw = jnp.ones((1, nb_l, R), jnp.float32)

    H_new, W_new = single_layer_forward(Aw, V, W, H)
    jax.block_until_ready((H_new, W_new))

    H_ref, W_ref = _reference(Aw, V, W, H)
    # Relaxed tolerance: (W^T W)H reassociation, per-tile accumulation order and the
    # EUP approximate reciprocal in the H update all change rounding vs. the reference.
    assert jnp.all(jnp.isfinite(H_new)) and jnp.all(jnp.isfinite(W_new))
    assert jnp.allclose(H_new, H_ref, rtol=2e-2, atol=2e-2), "H mismatch"
    assert jnp.allclose(W_new, W_ref, rtol=2e-2, atol=2e-2), "W mismatch"

    print("KERNEL_OK")
</pallas_src>

<mosaic_0001>
module attributes {stable_mosaic.version = 11 : i64} {
  func.func @_single_layer_kernel(%arg0: i32, %arg1: i32, %arg2: memref<1x16x4xf32, #tpu.memory_space<vmem>>, %arg3: memref<1x16x128xf32, #tpu.memory_space<vmem>>, %arg4: memref<1x4x16xf32, #tpu.memory_space<vmem>>, %arg5: memref<1x16x4xf32, #tpu.memory_space<vmem>>, %arg6: memref<1x4x128xf32, #tpu.memory_space<vmem>>, %arg7: memref<1x4x128xf32, #tpu.memory_space<vmem>>, %arg8: memref<1x16x4xf32, #tpu.memory_space<vmem>>, %arg9: memref<4x4xf32, #tpu.memory_space<vmem>>, %arg10: memref<4x4xf32, #tpu.memory_space<vmem>>, %arg11: memref<16x4xf32, #tpu.memory_space<vmem>>) attributes {dimension_semantics = [#tpu.dimension_semantics<parallel>, #tpu.dimension_semantics<arbitrary>], iteration_bounds = array<i64: 2, 1>, scalar_prefetch = 0 : i64, scratch_operands = 3 : i64, tpu.core_type = #tpu.core_type<tc>, window_params = [{pipeline_mode = #tpu.pipeline_mode<synchronous>, transform_indices = @transform_0, window_bounds = array<i64: 1, 16, 4>}, {transform_indices = @transform_1, window_bounds = array<i64: 1, 16, 128>}, {transform_indices = @transform_2, window_bounds = array<i64: 1, 4, 16>}, {transform_indices = @transform_3, window_bounds = array<i64: 1, 16, 4>}, {transform_indices = @transform_4, window_bounds = array<i64: 1, 4, 128>}, {transform_indices = @transform_5, window_bounds = array<i64: 1, 4, 128>}, {transform_indices = @transform_6, window_bounds = array<i64: 1, 16, 4>}]} {
    %c0_i32 = arith.constant 0 : i32
    %0 = arith.cmpi eq, %arg1, %c0_i32 : i32
    %1 = arith.extui %0 : i1 to i32
    %c0_i32_0 = arith.constant 0 : i32
    %2 = arith.cmpi ne, %1, %c0_i32_0 : i32
    scf.if %2 {
      %c0_27 = arith.constant 0 : index
      %c0_28 = arith.constant 0 : index
      %c0_29 = arith.constant 0 : index
      %61 = vector.load %arg4[%c0_27, %c0_28, %c0_29] : memref<1x4x16xf32, #tpu.memory_space<vmem>>, vector<1x4x16xf32>
      %62 = vector.shape_cast %61 : vector<1x4x16xf32> to vector<4x16xf32>
      %c0_30 = arith.constant 0 : index
      %c0_31 = arith.constant 0 : index
      %c0_32 = arith.constant 0 : index
      %63 = vector.load %arg5[%c0_30, %c0_31, %c0_32] : memref<1x16x4xf32, #tpu.memory_space<vmem>>, vector<1x16x4xf32>
      %64 = vector.shape_cast %63 : vector<1x16x4xf32> to vector<16x4xf32>
      %cst_33 = arith.constant dense<0.000000e+00> : vector<4x4xf32>
      %65 = tpu.matmul %62, %64, %cst_33 {dimension_numbers = #tpu.dot_dimension_numbers<[1], [0], [0], [1], [0, 0, 1, 1], [], []>} : vector<4x16xf32>, vector<16x4xf32>, vector<4x4xf32> -> vector<4x4xf32>
      %c0_34 = arith.constant 0 : index
      %c0_35 = arith.constant 0 : index
      %66 = vector.load %arg9[%c0_34, %c0_35] : memref<4x4xf32, #tpu.memory_space<vmem>>, vector<4x4xf32>
      tpu.vector_store %arg9[%c0_34, %c0_35], %65 {strides = array<i32>} : memref<4x4xf32, #tpu.memory_space<vmem>>, vector<4x4xf32>,
      %cst_36 = arith.constant 0.000000e+00 : f32
      %67 = vector.broadcast %cst_36 : f32 to vector<4x4xf32>
      %c0_37 = arith.constant 0 : index
      %c0_38 = arith.constant 0 : index
      %68 = vector.load %arg10[%c0_37, %c0_38] : memref<4x4xf32, #tpu.memory_space<vmem>>, vector<4x4xf32>
      tpu.vector_store %arg10[%c0_37, %c0_38], %67 {strides = array<i32>} : memref<4x4xf32, #tpu.memory_space<vmem>>, vector<4x4xf32>,
      %cst_39 = arith.constant 0.000000e+00 : f32
      %69 = vector.broadcast %cst_39 : f32 to vector<16x4xf32>
      %c0_40 = arith.constant 0 : index
      %c0_41 = arith.constant 0 : index
      %70 = vector.load %arg11[%c0_40, %c0_41] : memref<16x4xf32, #tpu.memory_space<vmem>>, vector<16x4xf32>
      tpu.vector_store %arg11[%c0_40, %c0_41], %69 {strides = array<i32>} : memref<16x4xf32, #tpu.memory_space<vmem>>, vector<16x4xf32>,
    } else {
    }
    %c0 = arith.constant 0 : index
    %c0_1 = arith.constant 0 : index
    %c0_2 = arith.constant 0 : index
    %3 = vector.load %arg3[%c0, %c0_1, %c0_2] : memref<1x16x128xf32, #tpu.memory_space<vmem>>, vector<1x16x128xf32>
    %4 = vector.shape_cast %3 : vector<1x16x128xf32> to vector<16x128xf32>
    %c0_3 = arith.constant 0 : index
    %c0_4 = arith.constant 0 : index
    %c0_5 = arith.constant 0 : index
    %5 = vector.load %arg6[%c0_3, %c0_4, %c0_5] : memref<1x4x128xf32, #tpu.memory_space<vmem>>, vector<1x4x128xf32>
    %6 = vector.shape_cast %5 : vector<1x4x128xf32> to vector<4x128xf32>
    %c0_6 = arith.constant 0 : index
    %c0_7 = arith.constant 0 : index
    %c0_8 = arith.constant 0 : index
    %7 = vector.load %arg4[%c0_6, %c0_7, %c0_8] : memref<1x4x16xf32, #tpu.memory_space<vmem>>, vector<1x4x16xf32>
    %8 = vector.shape_cast %7 : vector<1x4x16xf32> to vector<4x16xf32>
    %cst = arith.constant dense<0.000000e+00> : vector<4x128xf32>
    %9 = tpu.matmul %8, %4, %cst {dimension_numbers = #tpu.dot_dimension_numbers<[1], [0], [0], [1], [0, 0, 1, 1], [], []>} : vector<4x16xf32>, vector<16x128xf32>, vector<4x128xf32> -> vector<4x128xf32>
    %c0_9 = arith.constant 0 : index
    %c0_10 = arith.constant 0 : index
    %10 = vector.load %arg9[%c0_9, %c0_10] : memref<4x4xf32, #tpu.memory_space<vmem>>, vector<4x4xf32>
    %11 = vector.extract_strided_slice %10 {offsets = [0, 0], sizes = [4, 1], strides = [1, 1]} : vector<4x4xf32> to vector<4x1xf32>
    %12 = vector.extract_strided_slice %6 {offsets = [0, 0], sizes = [1, 128], strides = [1, 1]} : vector<4x128xf32> to vector<1x128xf32>
    %13 = vector.broadcast %11 : vector<4x1xf32> to vector<4x128xf32>
    %14 = vector.broadcast %12 : vector<1x128xf32> to vector<4x128xf32>
    %15 = arith.mulf %13, %14 : vector<4x128xf32>
    %16 = vector.extract_strided_slice %10 {offsets = [0, 1], sizes = [4, 1], strides = [1, 1]} : vector<4x4xf32> to vector<4x1xf32>
    %17 = vector.extract_strided_slice %6 {offsets = [1, 0], sizes = [1, 128], strides = [1, 1]} : vector<4x128xf32> to vector<1x128xf32>
    %18 = vector.broadcast %16 : vector<4x1xf32> to vector<4x128xf32>
    %19 = vector.broadcast %17 : vector<1x128xf32> to vector<4x128xf32>
    %20 = arith.mulf %18, %19 : vector<4x128xf32>
    %21 = arith.addf %15, %20 : vector<4x128xf32>
    %22 = vector.extract_strided_slice %10 {offsets = [0, 2], sizes = [4, 1], strides = [1, 1]} : vector<4x4xf32> to vector<4x1xf32>
    %23 = vector.extract_strided_slice %6 {offsets = [2, 0], sizes = [1, 128], strides = [1, 1]} : vector<4x128xf32> to vector<1x128xf32>
    %24 = vector.broadcast %22 : vector<4x1xf32> to vector<4x128xf32>
    %25 = vector.broadcast %23 : vector<1x128xf32> to vector<4x128xf32>
    %26 = arith.mulf %24, %25 : vector<4x128xf32>
    %27 = arith.addf %21, %26 : vector<4x128xf32>
    %28 = vector.extract_strided_slice %10 {offsets = [0, 3], sizes = [4, 1], strides = [1, 1]} : vector<4x4xf32> to vector<4x1xf32>
    %29 = vector.extract_strided_slice %6 {offsets = [3, 0], sizes = [1, 128], strides = [1, 1]} : vector<4x128xf32> to vector<1x128xf32>
    %30 = vector.broadcast %28 : vector<4x1xf32> to vector<4x128xf32>
    %31 = vector.broadcast %29 : vector<1x128xf32> to vector<4x128xf32>
    %32 = arith.mulf %30, %31 : vector<4x128xf32>
    %33 = arith.addf %27, %32 : vector<4x128xf32>
    %34 = arith.mulf %6, %9 : vector<4x128xf32>
    %35 = tpu.reciprocal %33 {approx = true} : vector<4x128xf32> -> vector<4x128xf32>
    %36 = arith.mulf %34, %35 : vector<4x128xf32>
    %c128_i32 = arith.constant 128 : i32
    %37 = arith.muli %arg1, %c128_i32 : i32
    %38 = tpu.iota {dimensions = array<i32: 1>} : vector<1x128xi32>
    %39 = vector.broadcast %37 : i32 to vector<1x128xi32>
    %40 = arith.addi %39, %38 : vector<1x128xi32>
    %c16_i32 = arith.constant 16 : i32
    %41 = vector.broadcast %c16_i32 : i32 to vector<1x128xi32>
    %42 = arith.cmpi slt, %40, %41 : vector<1x128xi32>
    %cst_11 = arith.constant 0.000000e+00 : f32
    %43 = vector.shape_cast %42 : vector<1x128xi1> to vector<1x128xi1>
    %44 = vector.broadcast %43 : vector<1x128xi1> to vector<4x128xi1>
    %45 = vector.broadcast %cst_11 : f32 to vector<4x128xf32>
    %46 = arith.select %44, %36, %45 : vector<4x128xi1>, vector<4x128xf32>
    %c0_12 = arith.constant 0 : index
    %c0_13 = arith.constant 0 : index
    %c0_14 = arith.constant 0 : index
    %47 = vector.load %arg7[%c0_12, %c0_13, %c0_14] : memref<1x4x128xf32, #tpu.memory_space<vmem>>, vector<1x4x128xf32>
    %48 = vector.shape_cast %47 : vector<1x4x128xf32> to vector<4x128xf32>
    %49 = vector.shape_cast %46 : vector<4x128xf32> to vector<1x4x128xf32>
    tpu.vector_store %arg7[%c0_12, %c0_13, %c0_14], %49 {strides = array<i32>} : memref<1x4x128xf32, #tpu.memory_space<vmem>>, vector<1x4x128xf32>,
    %c0_15 = arith.constant 0 : index
    %c0_16 = arith.constant 0 : index
    %50 = vector.load %arg10[%c0_15, %c0_16] : memref<4x4xf32, #tpu.memory_space<vmem>>, vector<4x4xf32>
    %cst_17 = arith.constant dense<0.000000e+00> : vector<4x4xf32>
    %51 = tpu.matmul %46, %46, %cst_17 {dimension_numbers = #tpu.dot_dimension_numbers<[1], [1], [0], [0], [0, 0, 1, 0], [], []>} : vector<4x128xf32>, vector<4x128xf32>, vector<4x4xf32> -> vector<4x4xf32>
    %52 = arith.addf %50, %51 : vector<4x4xf32>
    %c0_18 = arith.constant 0 : index
    %c0_19 = arith.constant 0 : index
    %53 = vector.load %arg10[%c0_18, %c0_19] : memref<4x4xf32, #tpu.memory_space<vmem>>, vector<4x4xf32>
    tpu.vector_store %arg10[%c0_18, %c0_19], %52 {strides = array<i32>} : memref<4x4xf32, #tpu.memory_space<vmem>>, vector<4x4xf32>,
    %c0_20 = arith.constant 0 : index
    %c0_21 = arith.constant 0 : index
    %54 = vector.load %arg11[%c0_20, %c0_21] : memref<16x4xf32, #tpu.memory_space<vmem>>, vector<16x4xf32>
    %cst_22 = arith.constant dense<0.000000e+00> : vector<16x4xf32>
    %55 = tpu.matmul %4, %46, %cst_22 {dimension_numbers = #tpu.dot_dimension_numbers<[1], [1], [0], [0], [0, 0, 1, 0], [], []>} : vector<16x128xf32>, vector<4x128xf32>, vector<16x4xf32> -> vector<16x4xf32>
    %56 = arith.addf %54, %55 : vector<16x4xf32>
    %c0_23 = arith.constant 0 : index
    %c0_24 = arith.constant 0 : index
    %57 = vector.load %arg11[%c0_23, %c0_24] : memref<16x4xf32, #tpu.memory_space<vmem>>, vector<16x4xf32>
    tpu.vector_store %arg11[%c0_23, %c0_24], %56 {strides = array<i32>} : memref<16x4xf32, #tpu.memory_space<vmem>>, vector<16x4xf32>,
    %c0_i32_25 = arith.constant 0 : i32
    %58 = arith.cmpi eq, %arg1, %c0_i32_25 : i32
    %59 = arith.extui %58 : i1 to i32
    %c0_i32_26 = arith.constant 0 : i32
    %60 = arith.cmpi ne, %59, %c0_i32_26 : i32
    scf.if %60 {
      %c0_27 = arith.constant 0 : index
      %c0_28 = arith.constant 0 : index
      %c0_29 = arith.constant 0 : index
      %61 = vector.load %arg5[%c0_27, %c0_28, %c0_29] : memref<1x16x4xf32, #tpu.memory_space<vmem>>, vector<1x16x4xf32>
      %62 = vector.shape_cast %61 : vector<1x16x4xf32> to vector<16x4xf32>
      %c0_30 = arith.constant 0 : index
      %c0_31 = arith.constant 0 : index
      %c0_32 = arith.constant 0 : index
      %63 = vector.load %arg2[%c0_30, %c0_31, %c0_32] : memref<1x16x4xf32, #tpu.memory_space<vmem>>, vector<1x16x4xf32>
      %64 = vector.shape_cast %63 : vector<1x16x4xf32> to vector<16x4xf32>
      %c0_33 = arith.constant 0 : index
      %c0_34 = arith.constant 0 : index
      %65 = vector.load %arg10[%c0_33, %c0_34] : memref<4x4xf32, #tpu.memory_space<vmem>>, vector<4x4xf32>
      %cst_35 = arith.constant dense<0.000000e+00> : vector<16x4xf32>
      %66 = tpu.matmul %62, %65, %cst_35 {dimension_numbers = #tpu.dot_dimension_numbers<[1], [0], [0], [1], [0, 0, 1, 1], [], []>} : vector<16x4xf32>, vector<4x4xf32>, vector<16x4xf32> -> vector<16x4xf32>
      %c0_36 = arith.constant 0 : index
      %c0_37 = arith.constant 0 : index
      %67 = vector.load %arg11[%c0_36, %c0_37] : memref<16x4xf32, #tpu.memory_space<vmem>>, vector<16x4xf32>
      %68 = arith.divf %67, %66 : vector<16x4xf32>
      %69 = arith.mulf %64, %68 : vector<16x4xf32>
      %70 = arith.mulf %62, %69 : vector<16x4xf32>
      %c0_38 = arith.constant 0 : index
      %c0_39 = arith.constant 0 : index
      %c0_40 = arith.constant 0 : index
      %71 = vector.load %arg8[%c0_38, %c0_39, %c0_40] : memref<1x16x4xf32, #tpu.memory_space<vmem>>, vector<1x16x4xf32>
      %72 = vector.shape_cast %71 : vector<1x16x4xf32> to vector<16x4xf32>
      %73 = vector.shape_cast %70 : vector<16x4xf32> to vector<1x16x4xf32>
      tpu.vector_store %arg8[%c0_38, %c0_39, %c0_40], %73 {strides = array<i32>} : memref<1x16x4xf32, #tpu.memory_space<vmem>>, vector<1x16x4xf32>,
    } else {
    }
    return
  }
  func.func @transform_0(%arg0: i32, %arg1: i32) -> (i32, i32, i32) {
    %c0_i32 = arith.constant 0 : i32
    %c0_i32_0 = arith.constant 0 : i32
    %c0_i32_1 = arith.constant 0 : i32
    %c0_i32_2 = arith.constant 0 : i32
    return %c0_i32, %c0_i32_0, %c0_i32_1 : i32, i32, i32
  }
  func.func @transform_1(%arg0: i32, %arg1: i32) -> (i32, i32, i32) {
    %c0_i32 = arith.constant 0 : i32
    %c0_i32_0 = arith.constant 0 : i32
    return %arg0, %c0_i32, %arg1 : i32, i32, i32
  }
  func.func @transform_2(%arg0: i32, %arg1: i32) -> (i32, i32, i32) {
    %c0_i32 = arith.constant 0 : i32
    %c0_i32_0 = arith.constant 0 : i32
    %c0_i32_1 = arith.constant 0 : i32
    return %arg0, %c0_i32, %c0_i32_0 : i32, i32, i32
  }
  func.func @transform_3(%arg0: i32, %arg1: i32) -> (i32, i32, i32) {
    %c0_i32 = arith.constant 0 : i32
    %c0_i32_0 = arith.constant 0 : i32
    %c0_i32_1 = arith.constant 0 : i32
    return %arg0, %c0_i32, %c0_i32_0 : i32, i32, i32
  }
  func.func @transform_4(%arg0: i32, %arg1: i32) -> (i32, i32, i32) {
    %c0_i32 = arith.constant 0 : i32
    %c0_i32_0 = arith.constant 0 : i32
    return %arg0, %c0_i32, %arg1 : i32, i32, i32
  }
  func.func @transform_5(%arg0: i32, %arg1: i32) -> (i32, i32, i32) {
    %c0_i32 = arith.constant 0 : i32
    %c0_i32_0 = arith.constant 0 : i32
    return %arg0, %c0_i32, %arg1 : i32, i32, i32
  }
  func.func @transform_6(%arg0: i32, %arg1: i32) -> (i32, i32, i32) {
    %c0_i32 = arith.constant 0 : i32
    %c0_i32_0 = arith.constant 0 : i32
    %c0_i32_1 = arith.constant 0 : i32
    return %arg0, %c0_i32, %c0_i32_0 : i32, i32, i32
  }
}

</mosaic_0001>

<bundles_post_ra>
// kernel: tpu_custom_call.1
= control target key start
LH: loop header
LB: loop body
LE: loop exit
PB: predicated region body
PF: predicated region fallthrough
CT: control target
= control target key end

     0   :  { %12 = vsyncpa [#allocation6], 0  ;;  %s1447_s0 = inlined_call_operand.vmem [shape: f32[1,16,4], index: 0, kind: input, shape index: {}]   ;;  %s1448_s1 = inlined_call_operand.vmem [shape: f32[2,16,128], index: 1, kind: input, shape index: {}]   ;;  %s1449_s2 = inlined_call_operand.vmem [shape: f32[2,4,16], index: 2, kind: input, shape index: {}]   ;;  %s1450_s3 = inlined_call_operand.vmem [shape: f32[2,16,4], index: 3, kind: input, shape index: {}]   ;;  %s1451_s4 = inlined_call_operand.vmem [shape: f32[2,4,128], index: 4, kind: input, shape index: {}]   ;;  %s1452_s5 = inlined_call_operand.hbm [shape: f32[2,4,128], index: 5, kind: output, shape index: {0}]   ;;  %s1453_s6 = inlined_call_operand.vmem [shape: f32[2,16,4], index: 6, kind: output, shape index: {1}]  }
   0x1   :  { %14 = vsyncpa [#allocation6 + $0x1], 0  ;;  %s1268_s21 = smov 0   ;;  %s1270_s22 = smov 0  }
   0x2   :  { %s1272_s23 = smov 0   ;;  %s1274_s24 = smov 0  }
   0x3   :  { %s1276_s25 = smov 0   ;;  %s1278_s26 = smov 0  }
   0x4 LB: > { %s994_s27 = sadd.s32 4294967295, %s1223_s26   ;;  %s995_s28 = sadd.s32 4294967294, %s1223_s26   ;;  %s1223_s26 = sphi %s1278_s26, %s20_s26   ;;  %s1219_s25 = sphi %s1276_s25, %s1460_s25   ;;  %s1215_s24 = sphi %s1274_s24, %s1459_s24   ;;  %s1211_s23 = sphi %s1272_s23, %s1458_s23   ;;  %s1207_s22 = sphi %s1270_s22, %s1457_s22   ;;  %s1203_s21 = sphi %s1268_s21, %s1456_s21  }
   0x5   : > { %s32_s29 = sadd.s32 1, %s1219_s25  ;;  %s170_s30 = sadd.s32 1, %s1211_s23 }
   0x6   : > { %p34_p0 = scmp.ge.s32.totalorder %s32_s29, 2  ;;  %p180_p1 = scmp.ne.s32.totalorder %s1211_s23, %s1207_s22 }
   0x7   : > { %p181_p2 = scmp.eq.s32.totalorder %s994_s27, 1  ;;  %p186_p3 = scmp.ne.s32.totalorder %s1207_s22, %s1203_s21 }
   0x8   : > { %s1462_s29 = smov (%p34_p0, %s32_s29), 0  ;;  %p187_p5 = scmp.eq.s32.totalorder %s995_s28, 1 }
   0x9   : > { %p1308_p4 = por %p181_p2, %p180_p1  ;;  %s165_s8 = ssub.s32 %s1219_s25, %s1462_s29 }
   0xa   : > { %p998_p6 = scmp.ge.s32.totalorder %s1223_s26, 1  ;;  %p168_p7 = scmp.eq.s32.totalorder %s165_s8, 0 }
   0xb   : > { %p1315_p8 = por %p187_p5, %p186_p3  ;;  %p270_p9 = scmp.lt.s32.totalorder %s1223_s26, 3 }
   0xc   : > { %s1321_s10 = scalar_select %p168_p7, %s1211_s23, %s170_s30  }
   0xd   : > { %p271_p10 = pnand %p998_p6, %p270_p9 }
   0xe   : > { %p324_p11 = scmp.lt.s32.totalorder (!%p271_p10), %s1215_s24, 1  ;;  %v1225_v0 = vmov (!%p271_p10), 0.0|0.0   ;;  %vm1226_vm0 = vmmov (!%p271_p10), 0   ;;  %v1227_v1 = vmov (!%p271_p10), 0.0   ;;  %vm360_vm1 = vcmask (!%p271_p10), 130048   ;;  %s1232_s30 = smov (!%p271_p10), [#allocation5]  }
   0xf   : > { %274 = sbr.rel (%p271_p10) target bundleno = 864 (0x360), region = 40  ;;  %1066 = vmatprep.subr.bf16.mxu0 (!%p271_p10), %v1225_v0  ;;  %1041 = vmatprep.mubr.msk.f32.mxu0 (!%p271_p10), %vm1226_vm0, %v1227_v1  ;;  %vm434_vm2 = vcmask (!%p271_p10), 27648   ;;  %v1228_v10 = vmov (!%p271_p10), 2   ;;  %v1229_v11 = vmov (!%p271_p10), 0   ;;  %v1230_v15 = vmov (!%p271_p10), 3   ;;  %s1149_s8 = sshll.u32 (!%p271_p10), %s1232_s30, 4  ;;  %s1150_s8 = int_to_ptr.vmem [resolvable:$false] %s1149_s8 }
  0x10   : > { %1069 = vmatprep.subr.bf16.mxu1 (!%p271_p10), %v1225_v0  ;;  %1048 = vmatprep.mubr.msk.f32.mxu1 (!%p271_p10), %vm1226_vm0, %v1227_v1  ;;  %436 = vst.msk [vmem:[#allocation3] sm:$0xf] (!%p271_p10), %vm434_vm2, %v1227_v1  ;;  %v1231_v16 = vmov (!%p271_p10), 1   ;;  %v524_v21 = vlaneseq (!%p271_p10)  ;;  %vm437_vm4 = vcmask (!%p271_p10), 31744   ;;  %vm742_vm5 = vcmask (!%p271_p10), 1043456  }
  0x11   : > { %1136 = vset.pattern.permute.xlu1 (!%p271_p10), %v1228_v10  ;;  %1134 = vset.pattern.permute.xlu0 (!%p271_p10), %v1229_v11  ;;  %438 = vst.msk [vmem:[#allocation4] sm:$0xff] (!%p271_p10), %vm437_vm4, %v1227_v1  ;;  %439 = vst.msk [vmem:[#allocation4 + $0x8] sm:$0xff] (!%p271_p10), %vm437_vm4, %v1227_v1 }
  0x12   : > { %v525_v22 = vshrl.u32 (!%p271_p10), %v524_v21, 7  ;;  %v564_v42 = vand.u32 (!%p271_p10), 127, %v524_v21 }
  0x14   : > { %v526_v23 = vsub.s32 (!%p271_p10), 0, %v525_v22  ;;  %v535_v24 = vsub.s32 (!%p271_p10), 1, %v525_v22  ;;  %v545_v25 = vsub.s32 (!%p271_p10), 2, %v525_v22  ;;  %v555_v29 = vsub.s32 (!%p271_p10), 3, %v525_v22 }
  0x15   : > { %vm567_vm3 = vcmp.lt.s32.totalorder (!%p271_p10), %v564_v42, 16 }
  0x16   : > { %s1327_s11 = scalar_select %p324_p11, %s1215_s24, 1 }
  0x17   : > { %v572_v46 = vld [vmem:[#allocation3] sm:$0xf] }
  0x18   : > { %s1332_s12 = sshll.u32 %s1327_s11, 4  ;;  %s1002_s13 = sshll.u32 %s1327_s11, 2  ;;  %v647_v52 = vld [vmem:[#allocation4 + $0x8] sm:$0xff]  ;;  %v646_v53 = vld [vmem:[#allocation4] sm:$0xff] }
  0x19   : > { %s340_s16 = scalar_lea.vmem %s1450_s3, %s1332_s12  ;;  %s335_s19 = scalar_lea.vmem %s1449_s2, %s1002_s13 }
  0x1a   : > { %v1339_v2 = vld [vmem:[%s340_s16] sm:$0xff]  ;;  %v1341_v3 = vld [vmem:[%s340_s16 + $0x8] sm:$0xff]  ;;  %s331_s28 = scalar_lea.vmem %s1448_s1, %s1332_s12  ;;  %s347_s14 = scalar_lea.vmem %s1451_s4, %s1002_s13 }
  0x1b   : > { %v1067_v4 = vpack.c.bf16 %v1341_v3, %v1339_v2  ;;  %v440_v5 = vld [vmem:[%s331_s28] sm:$0xff]  ;;  %v1354_v6 = vld [vmem:[%s331_s28 + $0x8] sm:$0xff]  ;;  %s314_s11 = sand.u32 1, %s1207_s22   ;;  %s1017_s16 = sshll.u32 %s1215_s24, 6 }
  0x1c   : > { %v357_v7 = vld [vmem:[%s335_s19] sm:$0xf]  ;;  %v1070_v8 = vpack.c.bf16 %v1354_v6, %v440_v5  ;;  %s1371_s13 = sshll.u32 %s314_s11, 2  ;;  %s1390_s20 = scalar_lea.hbm %s1452_s5, %s1017_s16 }
  0x1d   : > { %1068 = vmatpush3.bf16.msra.mxu0 %v1067_v4  ;;  %v443_v9 = vld [vmem:[%s335_s19] sm:$0xf]  ;;  %s316_s15 = scalar_lea.vmem [#allocation5], %s1371_s13  ;;  %s834_s27 = scalar_lea.sflag [#allocation6], %s314_s11 }
  0x1e   : > { %1051 = vmatprep.subr.mxu0 %v1227_v1  ;;  %1071 = vmatpush3.bf16.msra.mxu1 %v1070_v8  ;;  %v442_v17 = vld [vmem:[%s347_s14] sm:$0xf]  ;;  %s853_s17 = sshll.u32 %s316_s15, 4  ;;  %s1151_s14 = scalar_lea.vmem %s1150_s8, 128  ;;  %s854_s17 = int_to_ptr.vmem [resolvable:$true] %s853_s17 }
  0x1f   : > { %v527_v28 = vrot.slane %v442_v17, %v526_v23  ;;  %v536_v30 = vrot.slane %v442_v17, %v535_v24  ;;  %v546_v31 = vrot.slane %v442_v17, %v545_v25  ;;  %v556_v34 = vrot.slane %v442_v17, %v555_v29  ;;  %s1145_s28 = scalar_lea.vmem %s854_s17, 64  ;;  %p1152_p1 = scmp.lt.s32.totalorder %s854_s17, %s1150_s8 }
  0x20   : > { %1042 = vmatmul.mubr.msk.f32.vlgmr.msra.gmra.mrb[0].mxu0 %vm360_vm1, %v357_v7  ;;  %p1146_p12 = scmp.ne.s32.totalorder %s854_s17, %s1145_s28  ;;  %p1153_p2 = scmp.lt.s32.totalorder %s1151_s14, %s1145_s28 }
  0x21   : > { %1053 = vmatprep.mubr.msk.f32.mxu0 %vm1226_vm0, %v1227_v1  ;;  %1049 = vmatmul.mubr.msk.f32.vlgmr.msra.gmra.mrb[0].mxu1 %vm360_vm1, %v443_v9 }
  0x22   : > { %1058 = vmatprep.mubr.f32.mxu1 %v440_v5  ;;  %p1147_p13 = pnand %p1146_p12, %p1308_p4  ;;  %p1154_p3 = por %p1153_p2, %p1152_p1 }
  0x24   : > { %p1148_p0 = pneg %p1147_p13 }
  0x26   : > { %p1155_p5 = pnand %p1154_p3, %p1148_p0 }
  0xf3   : > { %v430_v12 = vpop.f32.mrb[0].mxu0 }
  0xf4   : > { %435 = vst.msk [vmem:[#allocation2] sm:$0xf] %vm434_vm2, %v430_v12  ;;  %v1043_v13 = vpop.f32.mrb[1].mxu0  ;;  %v514_v18 = vpop.f32.mrb[0].mxu1 }
  0xf5   : > { %v559_v19 = vmul.f32 %v514_v18, %v442_v17  ;;  %v1050_v20 = vpop.f32.mrb[1].mxu1 }
  0xfb   : > { %v518_v14 = vld [vmem:[#allocation2] sm:$0xf] }
  0xfc   : > { %540 = vperm.xlu1 %1136, %v518_v14   ;;  %521 = vperm.xlu0 %1134, %v518_v14  }
 0x100   : > { %1137 = vset.pattern.permute.xlu1 %v1230_v15  ;;  %1135 = vset.pattern.permute.xlu0 %v1231_v16 }
 0x101   : > { %550 = vperm.xlu1 %1137, %v518_v14   ;;  %530 = vperm.xlu0 %1135, %v518_v14  }
 0x105   : > { %1138 = vset.pattern.permute.xlu0 %v1230_v15 }
 0x17b   : > { %v522_v26 = vpop.permute.xlu0 %521  ;;  %v541_v27 = vpop.permute.xlu1 %540 }
 0x17c   : > { %v528_v33 = vmul.f32 %v527_v28, %v522_v26  ;;  %v547_v37 = vmul.f32 %v546_v31, %v541_v27 }
 0x180   : > { %v531_v32 = vpop.permute.xlu0 %530  ;;  %v551_v36 = vpop.permute.xlu1 %550 }
 0x181   : > { %v537_v35 = vmul.f32 %v536_v30, %v531_v32  ;;  %v557_v39 = vmul.f32 %v556_v34, %v551_v36 }
 0x183   : > { %v538_v38 = vadd.f32 %v537_v35, %v528_v33 }
 0x185   : > { %v548_v40 = vadd.f32 %v547_v37, %v538_v38 }
 0x187   : > { %v558_v41 = vadd.f32 %v557_v39, %v548_v40 }
 0x189   : > { %1139 = vrcp.f32 %v558_v41 }
 0x193   : > { %v1140_v43 = vpop.eup %1139 }
 0x194   : > { %v561_v44 = vmul.f32 %v1140_v43, %v559_v19 }
 0x196   : > { %1052 = vmatpush3.xpose.msk.msra.mxu0 %vm567_vm3, %v561_v44  ;;  %1056 = vmatprep.subr.msk.mxu1 %vm567_vm3, %v561_v44  ;;  %v570_v45 = vsel %vm567_vm3, %v561_v44, 0.0 }
 0x197   : > { %1057 = vmatpush3.xpose.msk.msra.mxu1 %vm567_vm3, %v561_v44  ;;  %571 = vst [vmem:[%s316_s15] sm:$0xf] %v570_v45 }
 0x199   : > { %1054 = vmatmul.mubr.msk.f32.vlgmr.msra.gmra.mrb[2].mxu0 %vm567_vm3, %v561_v44 }
 0x19a   : > { %1059 = vmatmul.mubr.f32.vlgmr.msra.gmra.mrb[2].mxu1 %v1354_v6  ;;  %1063 = vmatprep.mubr.msk.f32.mxu0 %vm437_vm4, %v1339_v2 }
 0x26c   : > { %v639_v47 = vpop.f32.mrb[2].mxu0 }
 0x26d   : > { %v643_v48 = vadd.f32 %v639_v47, %v572_v46  ;;  %v1055_v49 = vpop.f32.mrb[3].mxu0  ;;  %v1060_v51 = vpop.f32.mrb[2].mxu1 }
 0x26e   : > { %v714_v54 = vpop.f32.mrb[3].mxu1  ;;  %v724_v55 = vadd.f32 %v1060_v51, %v647_v52 }
 0x26f   : > { %645 = vst.msk [vmem:[#allocation3] sm:$0xf] %vm434_vm2, %v643_v48  ;;  %v723_v56 = vadd.f32 %v714_v54, %v646_v53 }
 0x270   : > { %727 = vst.msk [vmem:[#allocation4 + $0x8] sm:$0xff] %vm437_vm4, %v724_v55 }
 0x271   : > { %726 = vst.msk [vmem:[#allocation4] sm:$0xff] %vm437_vm4, %v723_v56 }
 0x276   : > { %v735_v50 = vld [vmem:[#allocation3] sm:$0xf] }
 0x277   : > { %1061 = vmatprep.subr.msk.mxu0 %vm742_vm5, %v735_v50 }
 0x278   : > { %1062 = vmatpush3.msk.msra.mxu0 %vm742_vm5, %v735_v50 }
 0x279   : > { %1064 = vmatmul.mubr.msk.f32.vlgmr.msra.gmra.mrb[4].mxu0 %vm437_vm4, %v1341_v3 }
 0x27a   : > { %1158 = shalt.err (!%p1155_p5)
}
 0x27b   : > { %s1159_s24 = scalar_lea.hbm %s1390_s20, 64  ;;  %s1163_s15 = scalar_lea.hbm %s1452_s5, 128 }
 0x27c   : > { %p1160_p6 = scmp.ne.s32.totalorder %s1390_s20, %s1159_s24  ;;  %p1164_p10 = scmp.lt.u32.totalorder %s1390_s20, %s1452_s5 }
 0x27d   : > { %p1165_p11 = scmp.lt.u32.totalorder %s1163_s15, %s1159_s24  ;;  %p1167_p13 = scmp.lt.u32.totalorder %s1159_s24, %s1390_s20 }
 0x27e   : > { %p1161_p7 = pnand %p1160_p6, %p1308_p4 }
 0x27f   : > { %p1166_p12 = por %p1165_p11, %p1164_p10 }
 0x280   : > { %p1162_p9 = pneg %p1161_p7 }
 0x281   : > { %p1168_p0 = por %p1167_p13, %p1166_p12 }
 0x283   : > { %p1169_p1 = pnand %p1168_p0, %p1162_p9 }
 0x285   : > { %1172 = shalt.err (!%p1169_p1)
}
 0x286   : > { %1072 = dma.vmem_to_hbm [thread:$0]  (%p1308_p4), %s854_s17, 64, %s1390_s20, %s834_s27   ;;  %v822_v59 = vld [vmem:[#allocation4 + $0x8] sm:$0xff]  ;;  %v821_v60 = vld [vmem:[#allocation4] sm:$0xff]  ;;  %v733_v1 = vld [vmem:[%s1447_s0] sm:$0xff] }
 0x287   : > { %v734_v62 = vld [vmem:[%s1447_s0 + $0x8] sm:$0xff]  ;;  %s352_s20 = scalar_lea.vmem %s1453_s6, %s1332_s12 }
 0x34c   : > { %v1065_v57 = vpop.f32.mrb[4].mxu0 }
 0x34d   : > { %1141 = vrcp.f32 %v1065_v57  ;;  %v812_v58 = vpop.f32.mrb[5].mxu0 }
 0x34e   : > { %1143 = vrcp.f32 %v812_v58 }
 0x357   : > { %v1142_v61 = vpop.eup %1141 }
 0x358   : > { %v1144_v63 = vpop.eup %1143  ;;  %v826_v0 = vmul.f32 %v1142_v61, %v822_v59 }
 0x359   : > { %v824_v4 = vmul.f32 %v1144_v63, %v821_v60 }
 0x35a   : > { %v828_v5 = vmul.f32 %v826_v0, %v734_v62 }
 0x35b   : > { %v827_v6 = vmul.f32 %v824_v4, %v733_v1 }
 0x35c   : > { %v830_v7 = vmul.f32 %v828_v5, %v1341_v3 }
 0x35d   : > { %v829_v8 = vmul.f32 %v827_v6, %v1339_v2 }
 0x35e   : > { %832 = vst.msk [vmem:[%s352_s20 + $0x8] sm:$0xff] %vm437_vm4, %v830_v7 }
 0x35f   : > { %831 = vst.msk [vmem:[%s352_s20] sm:$0xff] %vm437_vm4, %v829_v8 }
 0x360 PF: > { %p1078_p4 = scmp.ge.s32.totalorder %s1223_s26, 2  ;;  %s868_s27 = sand.u32 1, %s1203_s21  }
 0x361   : > { %s869_s14 = scalar_lea.sflag [#allocation6], %s868_s27 }
 0x362   : > { %p1075_p2 = pnand %p1078_p4, %p1315_p8 }
 0x364   : > { %1198 = dma.done.wait (!%p1075_p2), %s869_s14, 64  }
 0x365   : > { %1200 = vsyncadd (!%p1075_p2), %s869_s14, 4294967232  ;;  %s20_s26 = sadd.s32 1, %s1223_s26   ;;  %s1456_s21 = smov %s1207_s22 }
 0x366   : > { %p17_p3 = scmp.ge.s32.totalorder %s20_s26, 4   ;;  %s1457_s22 = smov %s1211_s23 }
 0x367   : > { %s1458_s23 = smov %s1321_s10  ;;  %s1459_s24 = smov %s1219_s25 }
 0x368   : > { %s1460_s25 = smov %s1462_s29  ;;  %19 = sbr.rel (!%p17_p3) target bundleno = 4 (0x4), region = 104 }
 0x36f   :  { %882 = vsyncpa [#allocation6], 1 }
 0x370   :  { %884 = vsyncpa [#allocation6 + $0x1], 1 }

</bundles_post_ra>
